<compile_context>
chip_gen: v5e
topology: v5e:2x2
jax: 0.10.0
libtpu: 0.0.40
codegen_flags: <defaults>
</compile_context>

<pallas_src>
import functools

import jax
import jax.numpy as jnp
from jax import lax
from jax.experimental import pallas as pl
from jax.experimental.pallas import tpu as pltpu

_LANE = 128
_DEFAULT_TILE_BYTES = 8 * 1024 * 1024   # per-step x tile target (double-buffered)
_MAX_BLOCK_M = 1024                     # keeps (block_m, 1) out / (block_m, 128) acc small
_MAX_BLOCK_K_TILED = 8192               # bounds the unrolled lane-chunk loop (64 chunks)


def _round_up(n, m):
    return ((n + m - 1) // m) * m


def _round_down(n, m):
    return (n // m) * m


def _sublane(itemsize):
    # f32 -> 8, bf16 -> 16, int8/fp8 -> 32 (sub-32-bit dtypes pack along sublanes).
    return max(8, 32 // max(1, itemsize))


def _critic_head_single_k_kernel(x_ref, w_ref, b_ref, o_ref):
    # One k step per batch tile: VPU multiply, one cross-lane reduce, add bias.
    x = x_ref[...].astype(jnp.float32)          # (bm, D)
    w = w_ref[...].astype(jnp.float32)          # (1,  D), resident in VMEM
    v = jnp.sum(x * w, axis=-1, keepdims=True) + b_ref[0]
    o_ref[...] = v.astype(o_ref.dtype)


def _critic_head_tiled_k_kernel(x_ref, w_ref, b_ref, o_ref, acc_ref, *,
                                block_k, grid_k, d_total, mask_tail):
    # Feature dim tiled: lane-dense (bm, 128) f32 accumulator, pure VALU adds
    # inside the k loop; the single cross-lane reduce only at k == last.
    k = pl.program_id(1)

    @pl.when(k == 0)
    def _init():
        acc_ref[...] = jnp.zeros_like(acc_ref)

    w = w_ref[k].astype(jnp.float32)            # (1, block_k); weight slab is resident
    acc = acc_ref[...]
    if mask_tail:
        lane_ids = lax.broadcasted_iota(jnp.int32, (1, _LANE), 1)
        col0 = k * block_k
    for c in range(block_k // _LANE):           # static, 128-aligned lane chunks
        lo, hi = c * _LANE, (c + 1) * _LANE
        prod = x_ref[:, lo:hi].astype(jnp.float32) * w[:, lo:hi]
        if mask_tail:
            # Zero columns past D on the overhanging last k block (garbage lanes).
            prod = jnp.where(col0 + lo + lane_ids < d_total, prod, 0.0)
        acc = acc + prod
    acc_ref[...] = acc

    @pl.when(k == grid_k - 1)
    def _finalize():
        v = jnp.sum(acc_ref[...], axis=-1, keepdims=True) + b_ref[0]
        o_ref[...] = v.astype(o_ref.dtype)


def critic_head(x, weight, bias, *, block_m=None, block_k=None,
                tile_bytes=_DEFAULT_TILE_BYTES, x_buffers=2):
    """Forward pass of CriticHead: x @ weight.T + bias.

    x: (B, D), weight: (1, D), bias: (1,)  ->  (B, 1) in x.dtype.
    `x_buffers` > 2 requests a deeper x pipeline (v7x sweep knob).
    """
    B, D = x.shape
    assert weight.shape == (1, D)
    assert bias.shape == (1,)
    bias = bias.astype(jnp.float32)             # SMEM scalar; accumulate in f32

    itemsize = jnp.dtype(x.dtype).itemsize
    sub = _sublane(itemsize)
    d_lane_bytes = _round_up(D, _LANE) * itemsize

    # ----- feature (reduction) tiling: prefer a single full-D block. -----
    if block_k is None:
        block_k = D if sub * d_lane_bytes <= tile_bytes else _MAX_BLOCK_K_TILED
    if block_k >= D:
        block_k, grid_k = D, 1
    else:
        assert block_k % _LANE == 0, "tiled feature dim needs block_k % 128 == 0"
        grid_k = pl.cdiv(D, block_k)

    # ----- batch tiling: no padding; the last block may overhang B. -----
    if block_m is None:
        lane_bytes = _round_up(block_k, _LANE) * itemsize
        bm_budget = max(sub, _round_down(tile_bytes // lane_bytes, sub))
        bm_half = _round_up(max(1, -(-B // 2)), sub)   # >=2 m-tiles when B allows (v7x 2 TCs)
        block_m = max(sub, min(bm_budget, bm_half, _MAX_BLOCK_M))
    grid_m = pl.cdiv(B, block_m)

    # x stream spec (optionally deeper-pipelined).
    if x_buffers == 2:
        x_spec = pl.BlockSpec((block_m, block_k), lambda i, k: (i, k))
    else:
        x_spec = pl.BlockSpec((block_m, block_k), lambda i, k: (i, k),
                              pipeline_mode=pl.Buffered(x_buffers))

    if grid_k == 1:
        kernel = _critic_head_single_k_kernel
        w_in = weight                                                 # (1, D)
        w_spec = pl.BlockSpec((1, D), lambda i, k: (0, 0))            # resident, one DMA
        scratch = []
    else:
        # Pad/reshape only the tiny weight row (never x) so the whole weight
        # slab sits resident in VMEM and is indexed by k inside the kernel.
        d_pad = grid_k * block_k
        w_in = weight if d_pad == D else jnp.pad(weight, ((0, 0), (0, d_pad - D)))
        w_in = w_in.reshape(grid_k, 1, block_k)
        w_spec = pl.BlockSpec((grid_k, 1, block_k), lambda i, k: (0, 0, 0))
        kernel = functools.partial(
            _critic_head_tiled_k_kernel, block_k=block_k, grid_k=grid_k,
            d_total=D, mask_tail=(D % block_k != 0))
        scratch = [pltpu.VMEM((block_m, _LANE), jnp.float32)]

    return pl.pallas_call(
        kernel,
        out_shape=jax.ShapeDtypeStruct((B, 1), x.dtype),
        grid_spec=pltpu.PrefetchScalarGridSpec(
            num_scalar_prefetch=0,
            grid=(grid_m, grid_k),                      # reduction axis last
            in_specs=[
                x_spec,
                w_spec,
                pl.BlockSpec(memory_space=pltpu.MemorySpace.SMEM),    # bias scalar
            ],
            out_specs=pl.BlockSpec((block_m, 1), lambda i, k: (i, 0)),
            scratch_shapes=scratch,
        ),
        compiler_params=pltpu.CompilerParams(
            dimension_semantics=("parallel", "arbitrary"),
            # 2x ~8 MiB x buffers + resident weight + narrow out/acc blocks:
            # above v5e's 16 MiB default scoped limit, below every
            # generation's physical VMEM (v7x: 64 MiB).
            vmem_limit_bytes=40 * 1024 * 1024,
        ),
    )(x, w_in, bias)


def init_critic_head_params(key, input_size):
    """Params matching CriticHead.__init__: orthogonal weight row, zero bias.

    nn.init.orthogonal_ on a (1, input_size) matrix yields a unit-norm row.
    """
    w = jax.random.normal(key, (1, input_size), dtype=jnp.float32)
    w = w / jnp.linalg.norm(w, axis=1, keepdims=True)
    b = jnp.zeros((1,), dtype=jnp.float32)
    return w, b


if __name__ == "__main__":
    key = jax.random.PRNGKey(0)
    k_x, k_w, k_x2, k_x3, k_w3 = jax.random.split(key, 5)

    # Small shapes consistent with the module: (batch, input_size).
    batch, input_size = 8, 32
    x = jax.random.normal(k_x, (batch, input_size), dtype=jnp.float32)
    weight, bias = init_critic_head_params(k_w, input_size)

    out = jax.block_until_ready(critic_head(x, weight, bias))
    ref = x @ weight.T + bias.reshape(1, 1)
    assert out.shape == (batch, 1)
    assert jnp.allclose(out, ref, atol=1e-5, rtol=1e-5)

    # Non-divisible batch: overhanging last m-block, no jnp.pad of x.
    batch2 = 10
    x2 = jax.random.normal(k_x2, (batch2, input_size), dtype=jnp.float32)
    out2 = jax.block_until_ready(critic_head(x2, weight, bias))
    ref2 = x2 @ weight.T + bias.reshape(1, 1)
    assert out2.shape == (batch2, 1)
    assert jnp.allclose(out2, ref2, atol=1e-5, rtol=1e-5)

    # Force the tiled-feature path (grid_k > 1) with a non-128-aligned D to
    # exercise the lane-dense accumulator and the tail-column masking.
    batch3, input_size3 = 16, 300
    x3 = jax.random.normal(k_x3, (batch3, input_size3), dtype=jnp.float32)
    weight3, _ = init_critic_head_params(k_w3, input_size3)
    bias3 = jnp.array([0.25], dtype=jnp.float32)
    out3 = jax.block_until_ready(
        critic_head(x3, weight3, bias3, block_m=8, block_k=128))
    ref3 = x3 @ weight3.T + bias3.reshape(1, 1)
    assert out3.shape == (batch3, 1)
    assert jnp.allclose(out3, ref3, atol=1e-4, rtol=1e-4)

    print("KERNEL_OK")
</pallas_src>

<mosaic_0001>
module attributes {stable_mosaic.version = 11 : i64} {
  func.func @_critic_head_single_k_kernel(%arg0: i32, %arg1: i32, %arg2: memref<8x32xf32, #tpu.memory_space<vmem>>, %arg3: memref<1x32xf32, #tpu.memory_space<vmem>>, %arg4: memref<1xf32, #tpu.memory_space<smem>>, %arg5: memref<8x1xf32, #tpu.memory_space<vmem>>) attributes {dimension_semantics = [#tpu.dimension_semantics<parallel>, #tpu.dimension_semantics<arbitrary>], iteration_bounds = array<i64: 1, 1>, scalar_prefetch = 0 : i64, scratch_operands = 0 : i64, tpu.core_type = #tpu.core_type<tc>, window_params = [{transform_indices = @transform_0, window_bounds = array<i64: 8, 32>}, {pipeline_mode = #tpu.pipeline_mode<synchronous>, transform_indices = @transform_1, window_bounds = array<i64: 1, 32>}, {transform_indices = @transform_2, window_bounds = array<i64: 1>}, {transform_indices = @transform_3, window_bounds = array<i64: 8, 1>}]} {
    %c0 = arith.constant 0 : index
    %c0_0 = arith.constant 0 : index
    %0 = vector.load %arg2[%c0, %c0_0] : memref<8x32xf32, #tpu.memory_space<vmem>>, vector<8x32xf32>
    %c0_1 = arith.constant 0 : index
    %c0_2 = arith.constant 0 : index
    %1 = vector.load %arg3[%c0_1, %c0_2] : memref<1x32xf32, #tpu.memory_space<vmem>>, vector<1x32xf32>
    %2 = vector.broadcast %1 : vector<1x32xf32> to vector<8x32xf32>
    %3 = arith.mulf %0, %2 : vector<8x32xf32>
    %cst = arith.constant dense<0.000000e+00> : vector<8xf32>
    %4 = vector.multi_reduction <add>, %3, %cst [1] : vector<8x32xf32> to vector<8xf32>
    %5 = vector.shape_cast %4 : vector<8xf32> to vector<8x1xf32>
    %c0_3 = arith.constant 0 : index
    %6 = memref.load %arg4[%c0_3] : memref<1xf32, #tpu.memory_space<smem>>
    %7 = vector.broadcast %6 : f32 to vector<8x1xf32>
    %8 = arith.addf %5, %7 : vector<8x1xf32>
    %c0_4 = arith.constant 0 : index
    %c0_5 = arith.constant 0 : index
    %9 = vector.load %arg5[%c0_4, %c0_5] : memref<8x1xf32, #tpu.memory_space<vmem>>, vector<8x1xf32>
    tpu.vector_store %arg5[%c0_4, %c0_5], %8 {strides = array<i32>} : memref<8x1xf32, #tpu.memory_space<vmem>>, vector<8x1xf32>,
    return
  }
  func.func @transform_0(%arg0: i32, %arg1: i32) -> (i32, i32) {
    %c0_i32 = arith.constant 0 : i32
    return %arg0, %arg1 : i32, i32
  }
  func.func @transform_1(%arg0: i32, %arg1: i32) -> (i32, i32) {
    %c0_i32 = arith.constant 0 : i32
    %c0_i32_0 = arith.constant 0 : i32
    %c0_i32_1 = arith.constant 0 : i32
    return %c0_i32, %c0_i32_0 : i32, i32
  }
  func.func @transform_2(%arg0: i32, %arg1: i32) -> i32 {
    %c0_i32 = arith.constant 0 : i32
    %c0_i32_0 = arith.constant 0 : i32
    return %c0_i32 : i32
  }
  func.func @transform_3(%arg0: i32, %arg1: i32) -> (i32, i32) {
    %c0_i32 = arith.constant 0 : i32
    %c0_i32_0 = arith.constant 0 : i32
    return %arg0, %c0_i32 : i32, i32
  }
}

</mosaic_0001>

<bundles_post_ra>
// kernel: tpu_custom_call.1
= control target key start
LH: loop header
LB: loop body
LE: loop exit
PB: predicated region body
PF: predicated region fallthrough
CT: control target
= control target key end

     0   :  { %9 = vsyncpa [#allocation4], 0  ;;  %s77_s15 = smov [#allocation3]   ;;  %s110_s0 = inlined_call_operand.hbm [shape: f32[8,32], index: 0, kind: input, shape index: {}]   ;;  %s111_s1 = inlined_call_operand.vmem [shape: f32[1,32], index: 1, kind: input, shape index: {}]   ;;  %s112_s2 = inlined_call_operand.<no memory space> [shape: f32[1], index: 2, kind: input, shape index: {}]   ;;  %s113_s3 = inlined_call_operand.vmem [shape: f32[8,1], index: 3, kind: output, shape index: {}]  }
   0x1   :  { %s15_s14 = sshll.u32 %s110_s0, 4  ;;  %s17_s16 = sshll.u32 %s77_s15, 4  ;;  %s16_s14 = int_to_ptr.hbm [resolvable:$true] %s15_s14  ;;  %s18_s16 = int_to_ptr.vmem [resolvable:$true] %s17_s16 }
   0x2   :  { %20 = dma.hbm_to_vmem [thread:$0]  %s16_s14, 128, %s18_s16, [#allocation4]  }
   0x3   :  { %75 = dma.done.wait [#allocation4], 128  }
   0x4   :  { %76 = vsyncadd [#allocation4], 4294967168  ;;  %v29_v0 = vld [vmem:[#allocation3] sm:$0xff]  ;;  %vm35_vm0 = vcmask 261120   ;;  %v40_v4 = vstv %s112_s2  ;;  %vm42_vm1 = vcmask 7168  }
   0x5   :  { %v50_v1 = vld [vmem:[%s111_s1] ss:$0 sm:$0xff] }
   0x6   :  { %v34_v2 = vmul.f32 %v50_v1, %v29_v0 }
   0x8   :  { %v36_v3 = vsel %vm35_vm0, %v34_v2, 0.0 }
   0x9   :  { %37 = vadd.xlane.f32.xlu0 %v36_v3 }
  0x7c   :  { %v38_v5 = vpop.xlane.xlu0 %37 }
  0x7d   :  { %v41_v6 = vadd.f32 %v40_v4, %v38_v5 }
  0x7f   :  { %43 = vst.msk [vmem:[%s113_s3] sm:$0xff] %vm42_vm1, %v41_v6 }
  0x80   :  { %48 = vsyncpa [#allocation4], 1 }

</bundles_post_ra>
